<compile_context>
chip_gen: v7x
topology: tpu7x:2x2x1
jax: 0.10.0
libtpu: 0.0.40
codegen_flags: <defaults>
</compile_context>

<pallas_src>
import jax
import jax.numpy as jnp
from jax.experimental import pallas as pl
from jax.experimental.pallas import tpu as pltpu


# ------------------------------- small helpers ---------------------------------

def _round_up(x, m):
    return (x + m - 1) // m * m


def _pick_tk(n_pad):
    # largest multiple of 128 that divides n_pad and is <= 512 (keeps VMEM use bounded at scale)
    for cand in (512, 384, 256, 128):
        if n_pad % cand == 0:
            return cand
    return n_pad


def _pad2(a, rows, cols):
    return jnp.zeros((rows, cols), a.dtype).at[: a.shape[0], : a.shape[1]].set(a)


# ----------------------------- fused Pallas kernel ------------------------------

def gin_fused_kernel(eps_ref, a_ref, x_ref, w_ref, b_ref, p_ref, wout_ref, bout_ref,
                     o_ref, h_scr, agg_scr):
    """grid = (num_conv_layers, num_src_tiles)."""
    l = pl.program_id(0)
    k = pl.program_id(1)
    n_layers = pl.num_programs(0)
    nk = pl.num_programs(1)
    tk = a_ref.shape[1]                       # static src/K tile width

    # First grid step: load the padded input features into the resident h buffer.
    @pl.when((l == 0) & (k == 0))
    def _():
        h_scr[...] = x_ref[...]

    # Start of every layer: reset the aggregation accumulator.
    @pl.when(k == 0)
    def _():
        agg_scr[...] = jnp.zeros_like(agg_scr)

    # Partial neighbor aggregation on the MXU: agg += A[:, k-tile] @ h[k-tile, :]
    k_start = pl.multiple_of(k * tk, tk)
    h_blk = h_scr[pl.ds(k_start, tk), :]
    agg_scr[...] += jnp.dot(a_ref[...], h_blk.astype(jnp.bfloat16),
                            preferred_element_type=jnp.float32)

    # Layer epilogue once the reduction over src tiles is complete.
    @pl.when(k == nk - 1)
    def _():
        h_old = h_scr[...]
        pre = (1.0 + eps_ref[l]) * h_old + agg_scr[...]
        y = jnp.dot(pre.astype(jnp.bfloat16), w_ref[0],
                    preferred_element_type=jnp.float32) + b_ref[0]
        h_scr[...] = jnp.maximum(y, 0.0)          # fused ReLU

    # Head: global mean pool + final Linear, only after the last conv layer.
    @pl.when((l == n_layers - 1) & (k == nk - 1))
    def _():
        # TODO(synk): F.dropout(p=0.5) before the head is identity in eval mode; training mode
        # would need pltpu.prng_seed + pltpu.stateful_bernoulli here.
        h_fin = h_scr[...]
        pooled = jnp.dot(p_ref[...], h_fin, preferred_element_type=jnp.float32)
        o_ref[...] = jnp.dot(pooled.astype(jnp.bfloat16), wout_ref[...],
                             preferred_element_type=jnp.float32) + bout_ref[...]


# ------------------------------- model wrapper ----------------------------------

def init_params(key, input_dim, hidden_dim, output_dim, num_layers, num_graphs):
    convs = []
    dims = [input_dim] + [hidden_dim] * (num_layers - 1)
    for i in range(num_layers - 1):
        key, kw, kb = jax.random.split(key, 3)
        d_in, d_out = dims[i], dims[i + 1]
        bound = 1.0 / jnp.sqrt(d_in)
        w = jax.random.uniform(kw, (d_in, d_out), jnp.float32, -bound, bound)
        b = jax.random.uniform(kb, (d_out,), jnp.float32, -bound, bound)
        eps = jnp.zeros((1,), jnp.float32)          # GINConv(train_eps=True) init eps = 0
        convs.append((w, b, eps))
    key, kw, kb = jax.random.split(key, 3)
    bound = 1.0 / jnp.sqrt(hidden_dim)
    w_out = jax.random.uniform(kw, (hidden_dim, output_dim), jnp.float32, -bound, bound)
    b_out = jax.random.uniform(kb, (output_dim,), jnp.float32, -bound, bound)
    return {"convs": convs, "lin": (w_out, b_out), "num_graphs": num_graphs}


def gin_forward(x, edge_index, batch, params):
    n, d_in = x.shape
    convs = params["convs"]
    w_out, b_out = params["lin"]
    num_graphs = params["num_graphs"]
    hidden = convs[0][0].shape[1]
    out_dim = w_out.shape[1]
    num_conv = len(convs)

    n_pad = _round_up(n, 128)
    d_pad = _round_up(max(d_in, hidden), 128)
    dout_pad = _round_up(out_dim, 128)
    g_pad = _round_up(num_graphs, 8)
    tk = _pick_tk(n_pad)
    nk = n_pad // tk

    # Dense adjacency: agg[i] = sum over edges e with dst_e == i of x[src_e].
    # TODO(synk): for large sparse graphs replace the dense O(N^2) A@h with a scalar-prefetch /
    # segment-sum gather formulation (cost O(E*D)); dense A is fine at these demo sizes.
    src, dst = edge_index[0], edge_index[1]
    a = jnp.zeros((n, n), jnp.float32).at[dst, src].add(1.0)
    a = _pad2(a, n_pad, n_pad).astype(jnp.bfloat16)          # counts are exact in bf16

    xp = _pad2(x.astype(jnp.float32), n_pad, d_pad)

    w_stack = jnp.stack([_pad2(w.astype(jnp.float32), d_pad, d_pad)
                         for (w, _, _) in convs]).astype(jnp.bfloat16)
    b_stack = jnp.stack([_pad2(b.astype(jnp.float32).reshape(1, -1), 1, d_pad)
                         for (_, b, _) in convs])
    eps_stack = jnp.concatenate([e.astype(jnp.float32) for (_, _, e) in convs])

    # global_mean_pool matrix (zero rows for padded graphs, zero cols for padded nodes).
    onehot = (batch[None, :] == jnp.arange(num_graphs)[:, None]).astype(jnp.float32)
    counts = jnp.maximum(onehot.sum(axis=1, keepdims=True), 1.0)
    p = _pad2(onehot / counts, g_pad, n_pad)

    wout_p = _pad2(w_out.astype(jnp.float32), d_pad, dout_pad).astype(jnp.bfloat16)
    bout_p = _pad2(b_out.astype(jnp.float32).reshape(1, -1), 1, dout_pad)

    grid_spec = pltpu.PrefetchScalarGridSpec(
        num_scalar_prefetch=1,                 # eps_stack -> SMEM, indexed per layer in-kernel
        grid=(num_conv, nk),
        in_specs=[
            # A column tiles; index_map is independent of the layer axis, so the tile is not
            # re-DMA'd when only l changes (with nk == 1 A is read from HBM exactly once).
            pl.BlockSpec((n_pad, tk), lambda l, k, *_: (0, k)),
            pl.BlockSpec((n_pad, d_pad), lambda l, k, *_: (0, 0)),        # x0   (read once)
            pl.BlockSpec((1, d_pad, d_pad), lambda l, k, *_: (l, 0, 0)),  # W_l  (pipelined / layer)
            pl.BlockSpec((1, 1, d_pad), lambda l, k, *_: (l, 0, 0)),      # b_l
            pl.BlockSpec((g_pad, n_pad), lambda l, k, *_: (0, 0)),        # P
            pl.BlockSpec((d_pad, dout_pad), lambda l, k, *_: (0, 0)),     # W_out
            pl.BlockSpec((1, dout_pad), lambda l, k, *_: (0, 0)),         # b_out
        ],
        out_specs=pl.BlockSpec((g_pad, dout_pad), lambda l, k, *_: (0, 0)),
        scratch_shapes=[
            pltpu.VMEM((n_pad, d_pad), jnp.float32),   # resident node features h (carried)
            pltpu.VMEM((n_pad, d_pad), jnp.float32),   # f32 aggregation accumulator
        ],
    )

    flops = (2 * num_conv * n_pad * n_pad * d_pad      # A @ h per layer
             + 2 * num_conv * n_pad * d_pad * d_pad    # h @ W per layer
             + 2 * g_pad * n_pad * d_pad               # P @ h
             + 2 * g_pad * d_pad * dout_pad)           # pooled @ W_out
    bytes_accessed = (n_pad * n_pad * 2 + n_pad * d_pad * 4
                      + num_conv * d_pad * d_pad * 2 + num_conv * d_pad * 4
                      + g_pad * n_pad * 4 + d_pad * dout_pad * 2 + dout_pad * 4
                      + g_pad * dout_pad * 4)

    out = pl.pallas_call(
        gin_fused_kernel,
        out_shape=jax.ShapeDtypeStruct((g_pad, dout_pad), jnp.float32),
        grid_spec=grid_spec,
        compiler_params=pltpu.CompilerParams(
            # Both grid axes are sequential: the layer axis carries h through VMEM scratch and
            # the src-tile axis is a reduction into agg_scr.  (A dst-row "parallel" axis to use
            # v7x's second TensorCore would need a double-buffered h carry; not done here.)
            dimension_semantics=("arbitrary", "arbitrary"),
            # Safe on every generation (v5e/v6e: 128 MiB physical, v7x: 64 MiB); the demo blocks
            # use well under 1 MiB and tk is capped at 512 so larger N still fits this budget.
            vmem_limit_bytes=32 * 1024 * 1024,
        ),
        cost_estimate=pl.CostEstimate(flops=flops, transcendentals=0,
                                      bytes_accessed=bytes_accessed),
    )(eps_stack, a, xp, w_stack, b_stack, p, wout_p, bout_p)

    return out[:num_graphs, :out_dim]


# --------------------- pure-JAX references for correctness ----------------------

def gin_forward_ref(x, edge_index, batch, params, mimic_bf16=False):
    """mimic_bf16=False: exact f32 PyTorch semantics.
    mimic_bf16=True : same bf16-input / f32-accumulate matmuls as the kernel."""
    def dot(u, v, low):
        if mimic_bf16 and low:
            u = u.astype(jnp.bfloat16)
            v = v.astype(jnp.bfloat16)
        return jnp.dot(u, v, preferred_element_type=jnp.float32)

    n = x.shape[0]
    src, dst = edge_index[0], edge_index[1]
    a = jnp.zeros((n, n), jnp.float32).at[dst, src].add(1.0)
    num_graphs = params["num_graphs"]
    onehot = (batch[None, :] == jnp.arange(num_graphs)[:, None]).astype(jnp.float32)
    counts = jnp.maximum(onehot.sum(axis=1, keepdims=True), 1.0)
    p = onehot / counts

    h = x.astype(jnp.float32)
    for (w, b, eps) in params["convs"]:
        agg = dot(a, h, True)
        h = jnp.maximum(dot((1.0 + eps[0]) * h + agg, w, True) + b, 0.0)
    w_out, b_out = params["lin"]
    pooled = dot(p, h, False)
    return dot(pooled, w_out, True) + b_out


# ------------------------------------ main ---------------------------------------

if __name__ == "__main__":
    key = jax.random.PRNGKey(0)

    N, E = 16, 32                    # nodes, edges
    INPUT_DIM, HIDDEN_DIM, OUTPUT_DIM = 8, 32, 4
    NUM_LAYERS, NUM_GRAPHS = 3, 2

    k_x, k_src, k_dst, k_par = jax.random.split(key, 4)
    x = jax.random.normal(k_x, (N, INPUT_DIM), jnp.float32)
    # two graphs: nodes 0..7 -> graph 0, nodes 8..15 -> graph 1; edges stay in-graph
    src0 = jax.random.randint(k_src, (E // 2,), 0, N // 2)
    dst0 = jax.random.randint(k_dst, (E // 2,), 0, N // 2)
    src1 = jax.random.randint(k_src, (E // 2,), N // 2, N)
    dst1 = jax.random.randint(k_dst, (E // 2,), N // 2, N)
    edge_index = jnp.stack([jnp.concatenate([src0, src1]),
                            jnp.concatenate([dst0, dst1])], axis=0).astype(jnp.int32)
    batch = jnp.concatenate([jnp.zeros(N // 2, jnp.int32),
                             jnp.ones(N // 2, jnp.int32)])

    params = init_params(k_par, INPUT_DIM, HIDDEN_DIM, OUTPUT_DIM,
                         NUM_LAYERS, NUM_GRAPHS)

    out = gin_forward(x, edge_index, batch, params)
    out = jax.block_until_ready(out)
    assert out.shape == (NUM_GRAPHS, OUTPUT_DIM)

    # Tight check against a reference using the same bf16-input / f32-accumulate matmuls.
    ref_bf = gin_forward_ref(x, edge_index, batch, params, mimic_bf16=True)
    assert jnp.allclose(out, ref_bf, atol=1e-3, rtol=1e-3), (out, ref_bf)

    # Loose sanity check against the exact f32 PyTorch semantics (bf16 rounding of A/W/h).
    ref_f32 = gin_forward_ref(x, edge_index, batch, params, mimic_bf16=False)
    assert jnp.allclose(out, ref_f32, atol=1e-1, rtol=1e-1), (out, ref_f32)

    print("KERNEL_OK")
</pallas_src>

<mosaic_0001>
module attributes {stable_mosaic.version = 11 : i64} {
  func.func @gin_fused_kernel(%arg0: i32, %arg1: i32, %arg2: memref<2xf32, #tpu.memory_space<smem>>, %arg3: memref<128x128xbf16, #tpu.memory_space<vmem>>, %arg4: memref<128x128xf32, #tpu.memory_space<vmem>>, %arg5: memref<1x128x128xbf16, #tpu.memory_space<vmem>>, %arg6: memref<1x1x128xf32, #tpu.memory_space<vmem>>, %arg7: memref<8x128xf32, #tpu.memory_space<vmem>>, %arg8: memref<128x128xbf16, #tpu.memory_space<vmem>>, %arg9: memref<1x128xf32, #tpu.memory_space<vmem>>, %arg10: memref<8x128xf32, #tpu.memory_space<vmem>>, %arg11: memref<128x128xf32, #tpu.memory_space<vmem>>, %arg12: memref<128x128xf32, #tpu.memory_space<vmem>>) attributes {dimension_semantics = [#tpu.dimension_semantics<arbitrary>, #tpu.dimension_semantics<arbitrary>], iteration_bounds = array<i64: 2, 1>, scalar_prefetch = 1 : i64, scratch_operands = 2 : i64, tpu.core_type = #tpu.core_type<tc>, window_params = [{transform_indices = @transform_0, window_bounds = array<i64: 128, 128>}, {pipeline_mode = #tpu.pipeline_mode<synchronous>, transform_indices = @transform_1, window_bounds = array<i64: 128, 128>}, {transform_indices = @transform_2, window_bounds = array<i64: 1, 128, 128>}, {transform_indices = @transform_3, window_bounds = array<i64: 1, 1, 128>}, {pipeline_mode = #tpu.pipeline_mode<synchronous>, transform_indices = @transform_4, window_bounds = array<i64: 8, 128>}, {pipeline_mode = #tpu.pipeline_mode<synchronous>, transform_indices = @transform_5, window_bounds = array<i64: 128, 128>}, {pipeline_mode = #tpu.pipeline_mode<synchronous>, transform_indices = @transform_6, window_bounds = array<i64: 1, 128>}, {pipeline_mode = #tpu.pipeline_mode<synchronous>, transform_indices = @transform_7, window_bounds = array<i64: 8, 128>}]} {
    %c0_i32 = arith.constant 0 : i32
    %0 = arith.cmpi eq, %arg0, %c0_i32 : i32
    %c0_i32_0 = arith.constant 0 : i32
    %1 = arith.cmpi eq, %arg1, %c0_i32_0 : i32
    %2 = arith.andi %0, %1 : i1
    %3 = arith.extui %2 : i1 to i32
    %c0_i32_1 = arith.constant 0 : i32
    %4 = arith.cmpi ne, %3, %c0_i32_1 : i32
    scf.if %4 {
      %c0_14 = arith.constant 0 : index
      %c0_15 = arith.constant 0 : index
      %26 = vector.load %arg4[%c0_14, %c0_15] : memref<128x128xf32, #tpu.memory_space<vmem>>, vector<128x128xf32>
      %c0_16 = arith.constant 0 : index
      %c0_17 = arith.constant 0 : index
      %27 = vector.load %arg11[%c0_16, %c0_17] : memref<128x128xf32, #tpu.memory_space<vmem>>, vector<128x128xf32>
      tpu.vector_store %arg11[%c0_16, %c0_17], %26 {strides = array<i32>} : memref<128x128xf32, #tpu.memory_space<vmem>>, vector<128x128xf32>,
    } else {
    }
    %c0_i32_2 = arith.constant 0 : i32
    %5 = arith.cmpi eq, %arg1, %c0_i32_2 : i32
    %6 = arith.extui %5 : i1 to i32
    %c0_i32_3 = arith.constant 0 : i32
    %7 = arith.cmpi ne, %6, %c0_i32_3 : i32
    scf.if %7 {
      %cst_14 = arith.constant 0.000000e+00 : f32
      %26 = vector.broadcast %cst_14 : f32 to vector<128x128xf32>
      %c0_15 = arith.constant 0 : index
      %c0_16 = arith.constant 0 : index
      %27 = vector.load %arg12[%c0_15, %c0_16] : memref<128x128xf32, #tpu.memory_space<vmem>>, vector<128x128xf32>
      tpu.vector_store %arg12[%c0_15, %c0_16], %26 {strides = array<i32>} : memref<128x128xf32, #tpu.memory_space<vmem>>, vector<128x128xf32>,
    } else {
    }
    %c128_i32 = arith.constant 128 : i32
    %8 = arith.muli %arg1, %c128_i32 : i32
    %9 = tpu.assume_multiple %8, 128 : i32
    %10 = arith.index_cast %9 : i32 to index
    %c0 = arith.constant 0 : index
    %11 = vector.load %arg11[%10, %c0] : memref<128x128xf32, #tpu.memory_space<vmem>>, vector<128x128xf32>
    %c0_4 = arith.constant 0 : index
    %c0_5 = arith.constant 0 : index
    %12 = vector.load %arg12[%c0_4, %c0_5] : memref<128x128xf32, #tpu.memory_space<vmem>>, vector<128x128xf32>
    %c0_6 = arith.constant 0 : index
    %c0_7 = arith.constant 0 : index
    %13 = vector.load %arg3[%c0_6, %c0_7] : memref<128x128xbf16, #tpu.memory_space<vmem>>, vector<128x128xbf16>
    %14 = arith.truncf %11 : vector<128x128xf32> to vector<128x128xbf16>
    %cst = arith.constant dense<0.000000e+00> : vector<128x128xf32>
    %15 = tpu.matmul %13, %14, %cst {dimension_numbers = #tpu.dot_dimension_numbers<[1], [0], [0], [1], [0, 0, 1, 1], [], []>} : vector<128x128xbf16>, vector<128x128xbf16>, vector<128x128xf32> -> vector<128x128xf32>
    %16 = arith.addf %12, %15 : vector<128x128xf32>
    %c0_8 = arith.constant 0 : index
    %c0_9 = arith.constant 0 : index
    %17 = vector.load %arg12[%c0_8, %c0_9] : memref<128x128xf32, #tpu.memory_space<vmem>>, vector<128x128xf32>
    tpu.vector_store %arg12[%c0_8, %c0_9], %16 {strides = array<i32>} : memref<128x128xf32, #tpu.memory_space<vmem>>, vector<128x128xf32>,
    %c0_i32_10 = arith.constant 0 : i32
    %18 = arith.cmpi eq, %arg1, %c0_i32_10 : i32
    %19 = arith.extui %18 : i1 to i32
    %c0_i32_11 = arith.constant 0 : i32
    %20 = arith.cmpi ne, %19, %c0_i32_11 : i32
    scf.if %20 {
      %c0_14 = arith.constant 0 : index
      %c0_15 = arith.constant 0 : index
      %26 = vector.load %arg11[%c0_14, %c0_15] : memref<128x128xf32, #tpu.memory_space<vmem>>, vector<128x128xf32>
      %27 = arith.index_cast %arg0 : i32 to index
      %28 = memref.load %arg2[%27] : memref<2xf32, #tpu.memory_space<smem>>
      %cst_16 = arith.constant 1.000000e+00 : f32
      %29 = arith.addf %cst_16, %28 : f32
      %30 = vector.broadcast %29 : f32 to vector<128x128xf32>
      %31 = arith.mulf %30, %26 : vector<128x128xf32>
      %c0_17 = arith.constant 0 : index
      %c0_18 = arith.constant 0 : index
      %32 = vector.load %arg12[%c0_17, %c0_18] : memref<128x128xf32, #tpu.memory_space<vmem>>, vector<128x128xf32>
      %33 = arith.addf %31, %32 : vector<128x128xf32>
      %34 = arith.truncf %33 : vector<128x128xf32> to vector<128x128xbf16>
      %c0_19 = arith.constant 0 : index
      %c0_20 = arith.constant 0 : index
      %c0_21 = arith.constant 0 : index
      %35 = vector.load %arg5[%c0_19, %c0_20, %c0_21] : memref<1x128x128xbf16, #tpu.memory_space<vmem>>, vector<1x128x128xbf16>
      %36 = vector.shape_cast %35 : vector<1x128x128xbf16> to vector<128x128xbf16>
      %cst_22 = arith.constant dense<0.000000e+00> : vector<128x128xf32>
      %37 = tpu.matmul %34, %36, %cst_22 {dimension_numbers = #tpu.dot_dimension_numbers<[1], [0], [0], [1], [0, 0, 1, 1], [], []>} : vector<128x128xbf16>, vector<128x128xbf16>, vector<128x128xf32> -> vector<128x128xf32>
      %c0_23 = arith.constant 0 : index
      %c0_24 = arith.constant 0 : index
      %c0_25 = arith.constant 0 : index
      %38 = vector.load %arg6[%c0_23, %c0_24, %c0_25] : memref<1x1x128xf32, #tpu.memory_space<vmem>>, vector<1x1x128xf32>
      %39 = vector.shape_cast %38 : vector<1x1x128xf32> to vector<1x128xf32>
      %40 = vector.broadcast %39 : vector<1x128xf32> to vector<128x128xf32>
      %41 = arith.addf %37, %40 : vector<128x128xf32>
      %cst_26 = arith.constant 0.000000e+00 : f32
      %42 = vector.broadcast %cst_26 : f32 to vector<128x128xf32>
      %43 = arith.maximumf %41, %42 : vector<128x128xf32>
      %c0_27 = arith.constant 0 : index
      %c0_28 = arith.constant 0 : index
      %44 = vector.load %arg11[%c0_27, %c0_28] : memref<128x128xf32, #tpu.memory_space<vmem>>, vector<128x128xf32>
      tpu.vector_store %arg11[%c0_27, %c0_28], %43 {strides = array<i32>} : memref<128x128xf32, #tpu.memory_space<vmem>>, vector<128x128xf32>,
    } else {
    }
    %c1_i32 = arith.constant 1 : i32
    %21 = arith.cmpi eq, %arg0, %c1_i32 : i32
    %c0_i32_12 = arith.constant 0 : i32
    %22 = arith.cmpi eq, %arg1, %c0_i32_12 : i32
    %23 = arith.andi %21, %22 : i1
    %24 = arith.extui %23 : i1 to i32
    %c0_i32_13 = arith.constant 0 : i32
    %25 = arith.cmpi ne, %24, %c0_i32_13 : i32
    scf.if %25 {
      %c0_14 = arith.constant 0 : index
      %c0_15 = arith.constant 0 : index
      %26 = vector.load %arg11[%c0_14, %c0_15] : memref<128x128xf32, #tpu.memory_space<vmem>>, vector<128x128xf32>
      %c0_16 = arith.constant 0 : index
      %c0_17 = arith.constant 0 : index
      %27 = vector.load %arg7[%c0_16, %c0_17] : memref<8x128xf32, #tpu.memory_space<vmem>>, vector<8x128xf32>
      %cst_18 = arith.constant dense<0.000000e+00> : vector<8x128xf32>
      %28 = tpu.matmul %27, %26, %cst_18 {dimension_numbers = #tpu.dot_dimension_numbers<[1], [0], [0], [1], [0, 0, 1, 1], [], []>} : vector<8x128xf32>, vector<128x128xf32>, vector<8x128xf32> -> vector<8x128xf32>
      %29 = arith.truncf %28 : vector<8x128xf32> to vector<8x128xbf16>
      %c0_19 = arith.constant 0 : index
      %c0_20 = arith.constant 0 : index
      %30 = vector.load %arg8[%c0_19, %c0_20] : memref<128x128xbf16, #tpu.memory_space<vmem>>, vector<128x128xbf16>
      %cst_21 = arith.constant dense<0.000000e+00> : vector<8x128xf32>
      %31 = tpu.matmul %29, %30, %cst_21 {dimension_numbers = #tpu.dot_dimension_numbers<[1], [0], [0], [1], [0, 0, 1, 1], [], []>} : vector<8x128xbf16>, vector<128x128xbf16>, vector<8x128xf32> -> vector<8x128xf32>
      %c0_22 = arith.constant 0 : index
      %c0_23 = arith.constant 0 : index
      %32 = vector.load %arg9[%c0_22, %c0_23] : memref<1x128xf32, #tpu.memory_space<vmem>>, vector<1x128xf32>
      %33 = vector.broadcast %32 : vector<1x128xf32> to vector<8x128xf32>
      %34 = arith.addf %31, %33 : vector<8x128xf32>
      %c0_24 = arith.constant 0 : index
      %c0_25 = arith.constant 0 : index
      %35 = vector.load %arg10[%c0_24, %c0_25] : memref<8x128xf32, #tpu.memory_space<vmem>>, vector<8x128xf32>
      tpu.vector_store %arg10[%c0_24, %c0_25], %34 {strides = array<i32>} : memref<8x128xf32, #tpu.memory_space<vmem>>, vector<8x128xf32>,
    } else {
    }
    return
  }
  func.func @transform_0(%arg0: i32, %arg1: i32, %arg2: memref<2xf32, #tpu.memory_space<smem>>) -> (i32, i32) {
    %c0_i32 = arith.constant 0 : i32
    %c0_i32_0 = arith.constant 0 : i32
    return %c0_i32, %arg1 : i32, i32
  }
  func.func @transform_1(%arg0: i32, %arg1: i32, %arg2: memref<2xf32, #tpu.memory_space<smem>>) -> (i32, i32) {
    %c0_i32 = arith.constant 0 : i32
    %c0_i32_0 = arith.constant 0 : i32
    %c0_i32_1 = arith.constant 0 : i32
    return %c0_i32, %c0_i32_0 : i32, i32
  }
  func.func @transform_2(%arg0: i32, %arg1: i32, %arg2: memref<2xf32, #tpu.memory_space<smem>>) -> (i32, i32, i32) {
    %c0_i32 = arith.constant 0 : i32
    %c0_i32_0 = arith.constant 0 : i32
    %c0_i32_1 = arith.constant 0 : i32
    return %arg0, %c0_i32, %c0_i32_0 : i32, i32, i32
  }
  func.func @transform_3(%arg0: i32, %arg1: i32, %arg2: memref<2xf32, #tpu.memory_space<smem>>) -> (i32, i32, i32) {
    %c0_i32 = arith.constant 0 : i32
    %c0_i32_0 = arith.constant 0 : i32
    %c0_i32_1 = arith.constant 0 : i32
    return %arg0, %c0_i32, %c0_i32_0 : i32, i32, i32
  }
  func.func @transform_4(%arg0: i32, %arg1: i32, %arg2: memref<2xf32, #tpu.memory_space<smem>>) -> (i32, i32) {
    %c0_i32 = arith.constant 0 : i32
    %c0_i32_0 = arith.constant 0 : i32
    %c0_i32_1 = arith.constant 0 : i32
    return %c0_i32, %c0_i32_0 : i32, i32
  }
  func.func @transform_5(%arg0: i32, %arg1: i32, %arg2: memref<2xf32, #tpu.memory_space<smem>>) -> (i32, i32) {
    %c0_i32 = arith.constant 0 : i32
    %c0_i32_0 = arith.constant 0 : i32
    %c0_i32_1 = arith.constant 0 : i32
    return %c0_i32, %c0_i32_0 : i32, i32
  }
  func.func @transform_6(%arg0: i32, %arg1: i32, %arg2: memref<2xf32, #tpu.memory_space<smem>>) -> (i32, i32) {
    %c0_i32 = arith.constant 0 : i32
    %c0_i32_0 = arith.constant 0 : i32
    %c0_i32_1 = arith.constant 0 : i32
    return %c0_i32, %c0_i32_0 : i32, i32
  }
  func.func @transform_7(%arg0: i32, %arg1: i32, %arg2: memref<2xf32, #tpu.memory_space<smem>>) -> (i32, i32) {
    %c0_i32 = arith.constant 0 : i32
    %c0_i32_0 = arith.constant 0 : i32
    %c0_i32_1 = arith.constant 0 : i32
    return %c0_i32, %c0_i32_0 : i32, i32
  }
}

</mosaic_0001>

<bundles_post_ra>
// kernel: tpu_custom_call.1
= control target key start
LH: loop header
LB: loop body
LE: loop exit
PB: predicated region body
PF: predicated region fallthrough
CT: control target
= control target key end

     0   :  { %s2248_s0 = inlined_call_operand.hbm [shape: f32[2], index: 0, kind: input, shape index: {}]   ;;  %s2249_s1 = inlined_call_operand.hbm [shape: bf16[128,128], index: 1, kind: input, shape index: {}]   ;;  %s2250_s2 = inlined_call_operand.hbm [shape: f32[128,128], index: 2, kind: input, shape index: {}]   ;;  %s2251_s3 = inlined_call_operand.hbm [shape: bf16[2,128,128], index: 3, kind: input, shape index: {}]   ;;  %s2252_s4 = inlined_call_operand.vmem [shape: f32[2,1,128], index: 4, kind: input, shape index: {}]   ;;  %s2253_s5 = inlined_call_operand.vmem [shape: f32[8,128], index: 5, kind: input, shape index: {}]   ;;  %s2254_s6 = inlined_call_operand.hbm [shape: bf16[128,128], index: 6, kind: input, shape index: {}]   ;;  %s2255_s7 = inlined_call_operand.vmem [shape: f32[1,128], index: 7, kind: input, shape index: {}]   ;;  %s2256_s8 = inlined_call_operand.hbm [shape: f32[8,128], index: 8, kind: output, shape index: {}]  }
   0x1   :  { %2266 = sst [smem:[#allocation20_spill]] %s2249_s1  ;;  %s1622_s29 = scalar_lea.hbm %s2248_s0, 16 }
   0x2   :  { %2267 = sst [smem:[#allocation21_spill]] %s2255_s7  ;;  %p1623_p0 = scmp.ne.s32.totalorder %s2248_s0, %s1622_s29 }
   0x3   :  { %2268 = sst [smem:[#allocation22_spill]] %s2256_s8  ;;  %p1626_p1 = scmp.lt.u32.totalorder %s1622_s29, %s2248_s0 }
   0x5   :  { %p1628_p2 = pnand %p1626_p1, %p1623_p0 }
   0x7   :  { %1631 = shalt.err (!%p1628_p2)  }
   0x8   :  { %s1842_s12 = smov [#allocation5]  }
   0x9   :  { %14 = dma.hbm_to_smem %s2248_s0, 16, %s1842_s12, [#allocation4] }
   0xa   :  { %1796 = dma.done.wait [#allocation4], 16 }
   0xb   :  { %1797 = vsyncadd [#allocation4], 4294967280 }
   0xc   :  { %16 = sfence }
   0xd   :  { %17 = vsyncpa [#allocation7], 0 }
   0xe   :  { %18 = vsyncpa [#allocation10], 0 }
   0xf   :  { %19 = vsyncpa [#allocation8], 0  ;;  %s1912_s15 = smov 0   ;;  %s1914_s16 = smov 0  }
  0x10   :  { %s1916_s17 = smov 0   ;;  %s1918_s18 = smov 0  }
  0x11   :  { %s1920_s19 = smov 0   ;;  %s1922_s20 = smov 0  }
  0x12 LB: > { %s1941_s0 = sadd.s32 4294967295, %s1840_s20   ;;  %p98_p3 = scmp.ne.s32.totalorder %s1828_s17, %s1824_s16  ;;  %s1840_s20 = sphi %s1922_s20, %s25_s20   ;;  %s1836_s19 = sphi %s1920_s19, %s2292_s19   ;;  %s1832_s18 = sphi %s1918_s18, %s2291_s18   ;;  %s1828_s17 = sphi %s1916_s17, %s2290_s17   ;;  %s1824_s16 = sphi %s1914_s16, %s2289_s16   ;;  %s1820_s15 = sphi %s1912_s15, %s2288_s15  }
  0x13   : > { %p99_p4 = scmp.eq.s32.totalorder %s1840_s20, 0  ;;  %p104_p5 = scmp.ne.s32.totalorder %s1824_s16, %s1820_s15 }
  0x14   : > { %p2257_p6 = scmp.eq.s32.totalorder %s1941_s0, 0  ;;  %p1248_p7 = scmp.ge.s32.totalorder %s1840_s20, 1 }
  0x15   : > { %p100_p8 = por %p99_p4, %p98_p3  ;;  %p225_p9 = scmp.lt.s32.totalorder %s1840_s20, 3 }
  0x16   : > { %p1952_p10 = por %p2257_p6, %p104_p5  ;;  %s1843_s23 = smov [#allocation6]  }
  0x17   : > { %p1956_p11 = pnand %p1248_p7, %p225_p9  ;;  %s239_s24 = sshll.u32 %s1843_s23, 4  ;;  %s240_s24 = int_to_ptr.vmem [resolvable:$true] %s239_s24 }
  0x18   : > { %s2269_s21 = scalar_select %p1952_p10, 1, 0 }
  0x19   : > { %s2270_s22 = scalar_select %p1956_p11, 1, 0 }
  0x1a   : > { %p1515_p12 = pneg %p1956_p11  ;;  %p1532_p0 = scmp.lt.s32.totalorder %s1840_s20, 2 }
  0x1b   : > { %s2273_s1 = sld [smem:[#allocation20_spill]] }
  0x1c   : > { %p1964_p13 = pnand %p1515_p12, %p2257_p6  ;;  %p1969_p1 = pnand %p1532_p0, %p100_p8 }
  0x1e   : > { %s2272_s26 = scalar_select %p1969_p1, 1, 0 }
  0x1f   : > { %p1981_p3 = pneg %p1964_p13 }
  0x21   : > { %s1632_s29 = scalar_lea.hbm %s2273_s1, 1024 }
  0x22   : > { %p1633_p2 = scmp.ne.s32.totalorder %s2273_s1, %s1632_s29  ;;  %p1639_p7 = scmp.lt.u32.totalorder %s1632_s29, %s2273_s1 }
  0x24   : > { %p1635_p4 = pnand %p1981_p3, %p1633_p2 }
  0x26   : > { %p1636_p5 = pneg %p1635_p4 }
  0x28   : > { %p1641_p8 = pnand %p1639_p7, %p1636_p5 }
  0x2a   : > { %1644 = shalt.err (!%p1641_p8)
}
  0x2b   : > { %s1645_s13 = scalar_lea.vmem %s240_s24, 1024  ;;  %p1653_p6 = scmp.lt.s32.totalorder %s240_s24, %s240_s24 }
  0x2c   : > { %p1646_p9 = scmp.ne.s32.totalorder %s240_s24, %s1645_s13  ;;  %p1654_p10 = scmp.lt.s32.totalorder %s1645_s13, %s1645_s13 }
  0x2e   : > { %p1648_p12 = pnand %p1646_p9, %p1981_p3  ;;  %p1655_p11 = por %p1654_p10, %p1653_p6 }
  0x30   : > { %p1649_p0 = pneg %p1648_p12 }
  0x32   : > { %p1656_p1 = pnand %p1655_p11, %p1649_p0 }
  0x34   : > { %1659 = shalt.err (!%p1656_p1)
}
  0x35   : > { %s2262_s14 = smov 64   ;;  %s2264_s15 = smov 4  }
  0x36   : > { %1518 = dma.hbm_to_vmem [thread:$0]  (!%p1964_p13), %s2273_s1, 1024, %s240_s24, [#allocation7], %s2262_s14, %s2262_s14, %s2264_s15  }
  0x37   : > { %s1846_s28 = smov [#allocation9]   ;;  %s1660_s11 = scalar_lea.hbm %s2250_s2, 2048 }
  0x38   : > { %s252_s29 = sshll.u32 %s1846_s28, 4  ;;  %p1661_p6 = scmp.ne.s32.totalorder %s2250_s2, %s1660_s11  ;;  %s253_s29 = int_to_ptr.vmem [resolvable:$true] %s252_s29 }
  0x39   : > { %p1667_p1 = scmp.lt.u32.totalorder %s1660_s11, %s2250_s2 }
  0x3a   : > { %p1663_p10 = pnand %p1661_p6, %p1981_p3 }
  0x3c   : > { %p1664_p11 = pneg %p1663_p10 }
  0x3e   : > { %p1669_p2 = pnand %p1667_p1, %p1664_p11 }
  0x40   : > { %1672 = shalt.err (!%p1669_p2)
}
  0x41   : > { %s1673_s24 = scalar_lea.vmem %s253_s29, 2048  ;;  %p1681_p8 = scmp.lt.s32.totalorder %s253_s29, %s253_s29 }
  0x42   : > { %p1674_p4 = scmp.ne.s32.totalorder %s253_s29, %s1673_s24  ;;  %p1682_p9 = scmp.lt.s32.totalorder %s1673_s24, %s1673_s24 }
  0x44   : > { %p1676_p5 = pnand %p1674_p4, %p1981_p3  ;;  %p1683_p12 = por %p1682_p9, %p1681_p8 }
  0x46   : > { %p1677_p7 = pneg %p1676_p5 }
  0x48   : > { %p1684_p0 = pnand %p1683_p12, %p1677_p7 }
  0x4a   : > { %1687 = shalt.err (!%p1684_p0)
}
  0x4b   : > { %s1847_s23 = smov 128   ;;  %s1848_s27 = smov 8  }
  0x4c   : > { %1521 = dma.hbm_to_vmem [thread:$0]  (!%p1964_p13), %s2250_s2, 2048, %s253_s29, [#allocation10], %s1847_s23, %s1847_s23, %s1848_s27  }
  0x4d   : > { %s1849_s28 = smov [#allocation12]   ;;  %s37_s9 = sadd.s32 1, %s1836_s19 }
  0x4e   : > { %s268_s30 = sshll.u32 %s1849_s28, 4  ;;  %s1688_s13 = scalar_lea.hbm %s2254_s6, 1024  ;;  %s269_s30 = int_to_ptr.vmem [resolvable:$true] %s268_s30 }
  0x4f   : > { %p1689_p6 = scmp.ne.s32.totalorder %s2254_s6, %s1688_s13  ;;  %p1695_p1 = scmp.lt.u32.totalorder %s1688_s13, %s2254_s6 }
  0x51   : > { %p1691_p10 = pnand %p1689_p6, %p1981_p3 }
  0x53   : > { %p1692_p11 = pneg %p1691_p10 }
  0x55   : > { %p1697_p2 = pnand %p1695_p1, %p1692_p11 }
  0x57   : > { %1700 = shalt.err (!%p1697_p2)
}
  0x58   : > { %s1701_s29 = scalar_lea.vmem %s269_s30, 1024  ;;  %p1709_p8 = scmp.lt.s32.totalorder %s269_s30, %s269_s30 }
  0x59   : > { %p1702_p4 = scmp.ne.s32.totalorder %s269_s30, %s1701_s29  ;;  %p1710_p9 = scmp.lt.s32.totalorder %s1701_s29, %s1701_s29 }
  0x5b   : > { %p1704_p5 = pnand %p1702_p4, %p1981_p3  ;;  %p1711_p12 = por %p1710_p9, %p1709_p8 }
  0x5d   : > { %p1705_p7 = pneg %p1704_p5 }
  0x5f   : > { %p1712_p0 = pnand %p1711_p12, %p1705_p7 }
  0x61   : > { %1715 = shalt.err (!%p1712_p0)
}
  0x62   : > { %s2275_s14 = smov 4   ;;  %s2276_s23 = smov 64  }
  0x63   : > { %1524 = dma.hbm_to_vmem [thread:$0]  (!%p1964_p13), %s2254_s6, 1024, %s269_s30, [#allocation10], %s2276_s23, %s2276_s23, %s2275_s14  }
  0x64   : > { %p39_p3 = scmp.ge.s32.totalorder %s37_s9, 2  ;;  %s91_s10 = sadd.s32 1, %s1828_s17 }
  0x65   : > { %s285_s27 = sand.u32 1, %s1840_s20   ;;  %s287_s7 = sand.u32 1, %s1828_s17  }
  0x66   : > { %s2294_s9 = smov (%p39_p3, %s37_s9), 0  ;;  %s1253_s25 = sshll.u32 %s287_s7, 6 }
  0x67   : > { %s88_s8 = ssub.s32 %s1836_s19, %s2294_s9  ;;  %s1293_s28 = sshll.u32 %s1836_s19, 10 }
  0x68   : > { %p89_p6 = scmp.eq.s32.totalorder %s88_s8, 0  ;;  %s2051_s13 = scalar_lea.hbm %s2251_s3, %s1293_s28 }
  0x69   : > { %s289_s30 = scalar_lea.vmem [#allocation11], %s1253_s25  ;;  %s2058_s1 = scalar_lea.sflag [#allocation7], %s285_s27 }
  0x6a   : > { %s296_s24 = sshll.u32 %s289_s30, 4  ;;  %s1716_s15 = scalar_lea.hbm %s2051_s13, 1024  ;;  %s2056_s24 = int_to_ptr.vmem [resolvable:$true] %s296_s24 }
  0x6b   : > { %s2054_s29 = scalar_select %p89_p6, %s1828_s17, %s91_s10  }
  0x6c   : > { %p1717_p13 = scmp.ne.s32.totalorder %s2051_s13, %s1716_s15  ;;  %p2277_p10 = scmp.ne.s32.totalorder %s2272_s26, 0 }
  0x6d   : > { %s1721_s28 = scalar_lea.hbm %s2251_s3, 2048  ;;  %p1722_p4 = scmp.lt.u32.totalorder %s2051_s13, %s2251_s3 }
  0x6e   : > { %p1718_p11 = pneg %p2277_p10  ;;  %p1723_p5 = scmp.lt.u32.totalorder %s1721_s28, %s1716_s15 }
  0x6f   : > { %p1725_p8 = scmp.lt.u32.totalorder %s1716_s15, %s2051_s13 }
  0x70   : > { %p1719_p1 = pnand %p1718_p11, %p1717_p13  ;;  %p1724_p7 = por %p1723_p5, %p1722_p4 }
  0x72   : > { %p1720_p2 = pneg %p1719_p1  ;;  %p1726_p9 = por %p1725_p8, %p1724_p7 }
  0x74   : > { %p1727_p12 = pnand %p1726_p9, %p1720_p2 }
  0x76   : > { %1730 = shalt.err (!%p1727_p12)
}
  0x77   : > { %s1731_s10 = scalar_lea.vmem %s2056_s24, 1024  ;;  %s1850_s27 = smov [#allocation11]  }
  0x78   : > { %p1732_p0 = scmp.ne.s32.totalorder %s2056_s24, %s1731_s10  ;;  %s1736_s12 = sshll.u32 %s1850_s27, 4  ;;  %s1737_s12 = int_to_ptr.vmem [resolvable:$false] %s1736_s12 }
  0x79   : > { %s1738_s30 = scalar_lea.vmem %s1737_s12, 2048  ;;  %p1739_p13 = scmp.lt.s32.totalorder %s2056_s24, %s1737_s12 }
  0x7a   : > { %p1734_p3 = pnand %p1732_p0, %p1718_p11  ;;  %p1740_p1 = scmp.lt.s32.totalorder %s1738_s30, %s1731_s10 }
  0x7c   : > { %p1735_p6 = pneg %p1734_p3  ;;  %p1741_p4 = por %p1740_p1, %p1739_p13 }
  0x7e   : > { %p1742_p5 = pnand %p1741_p4, %p1735_p6 }
  0x80   : > { %1745 = shalt.err (!%p1742_p5)
}
  0x81   : > { %1528 = dma.hbm_to_vmem [thread:$0]  (!%p2277_p10), %s2051_s13, 1024, %s2056_s24, %s2058_s1, %s2276_s23, %s2276_s23, %s2275_s14  }
  0x82   : > { %p2278_p11 = scmp.ne.s32.totalorder %s2270_s22, 0 }
  0x83   : > { %p2279_p2 = scmp.eq.s32.totalorder (!%p2278_p11), %s1941_s0, 0 }
  0x84   : > { %314 = sbr.rel (%p2278_p11) target bundleno = 1137 (0x471), region = 48 }
  0x8b   : > { %1799 = dma.done.wait (%p2279_p2), [#allocation7], 1024   ;;  %p2280_p7 = pmov %p2279_p2 }
  0x8c   : > { %p2281_p8 = pmov %p2279_p2 }
  0x8d   : > { %1801 = vsyncadd (%p2280_p7), [#allocation7], 4294966272 }
  0x8e   : > { %1803 = dma.done.wait (%p2281_p8), [#allocation10], 2048   ;;  %p2282_p9 = pmov %p2279_p2 }
  0x8f   : > { %s324_s26 = sand.u32 1, %s1941_s0   ;;  %s326_s14 = sand.u32 1, %s1824_s16  }
  0x90   : > { %1805 = vsyncadd (%p2282_p9), [#allocation10], 4294965248  ;;  %s1259_s23 = sshll.u32 %s326_s14, 6  ;;  %s325_s22 = scalar_lea.sflag [#allocation7], %s324_s26 }
  0x91   : > { %s2101_s13 = scalar_lea.vmem [#allocation11], %s1259_s23  ;;  %p2283_p10 = scmp.ne.s32.totalorder %s2269_s21, 0 }
  0x93   : > { %1807 = dma.done.wait (%p2283_p10), %s325_s22, 1024  }
  0x94   : > { %1809 = vsyncadd (%p2283_p10), %s325_s22, 4294966272  ;;  %p2284_p12 = pmov %p2279_p2 }
  0x95   : > { %p2285_p0 = pmov %p2279_p2 }
  0x96   : > { %1811 = dma.done.wait (%p2284_p12), [#allocation10], 1024  }
  0x97   : > { %1813 = vsyncadd (%p2285_p0), [#allocation10], 4294966272  ;;  %p361_p3 = scmp.lt.s32.totalorder %s1832_s18, 1  ;;  %p365_p6 = scmp.eq.s32.totalorder %s1832_s18, 0 }
  0x98   : > { %v371_v0 = vld [vmem:[#allocation9] sm:$0xff] (%p365_p6)  ;;  %v372_v1 = vld [vmem:[#allocation9 + $0x8] sm:$0xff] (%p365_p6)  ;;  %v373_v2 = vld [vmem:[#allocation9 + $0x10] sm:$0xff] (%p365_p6) }
  0x99   : > { %s2114_s24 = scalar_select %p361_p3, %s1832_s18, 1 }
  0x9a   : > { %370 = sbr.rel (!%p365_p6) target bundleno = 162 (0xa2), region = 68  ;;  %387 = vst [vmem:[#allocation2] sm:$0xff] (%p365_p6), %v371_v0  ;;  %388 = vst [vmem:[#allocation2 + $0x8] sm:$0xff] (%p365_p6), %v372_v1  ;;  %v374_v3 = vld [vmem:[#allocation9 + $0x18] sm:$0xff] (%p365_p6)  ;;  %v375_v4 = vld [vmem:[#allocation9 + $0x20] sm:$0xff] (%p365_p6) }
  0x9b   : > { %s363_s7 = scalar_lea.vmem %s2252_s4, %s2114_s24  ;;  %389 = vst [vmem:[#allocation2 + $0x10] sm:$0xff] (%p365_p6), %v373_v2  ;;  %v376_v5 = vld [vmem:[#allocation9 + $0x28] sm:$0xff] (%p365_p6)  ;;  %390 = vst [vmem:[#allocation2 + $0x18] sm:$0xff] (%p365_p6), %v374_v3  ;;  %v377_v6 = vld [vmem:[#allocation9 + $0x30] sm:$0xff] (%p365_p6) }
  0x9c   : > { %391 = vst [vmem:[#allocation2 + $0x20] sm:$0xff] (%p365_p6), %v375_v4  ;;  %392 = vst [vmem:[#allocation2 + $0x28] sm:$0xff] (%p365_p6), %v376_v5  ;;  %v378_v7 = vld [vmem:[#allocation9 + $0x38] sm:$0xff] (%p365_p6)  ;;  %v379_v8 = vld [vmem:[#allocation9 + $0x40] sm:$0xff] (%p365_p6) }
  0x9d   : > { %393 = vst [vmem:[#allocation2 + $0x30] sm:$0xff] (%p365_p6), %v377_v6  ;;  %394 = vst [vmem:[#allocation2 + $0x38] sm:$0xff] (%p365_p6), %v378_v7  ;;  %v380_v9 = vld [vmem:[#allocation9 + $0x48] sm:$0xff] (%p365_p6)  ;;  %v381_v10 = vld [vmem:[#allocation9 + $0x50] sm:$0xff] (%p365_p6) }
  0x9e   : > { %395 = vst [vmem:[#allocation2 + $0x40] sm:$0xff] (%p365_p6), %v379_v8  ;;  %v382_v11 = vld [vmem:[#allocation9 + $0x58] sm:$0xff] (%p365_p6)  ;;  %396 = vst [vmem:[#allocation2 + $0x48] sm:$0xff] (%p365_p6), %v380_v9  ;;  %v383_v12 = vld [vmem:[#allocation9 + $0x60] sm:$0xff] (%p365_p6) }
  0x9f   : > { %397 = vst [vmem:[#allocation2 + $0x50] sm:$0xff] (%p365_p6), %v381_v10  ;;  %398 = vst [vmem:[#allocation2 + $0x58] sm:$0xff] (%p365_p6), %v382_v11  ;;  %v384_v13 = vld [vmem:[#allocation9 + $0x68] sm:$0xff] (%p365_p6)  ;;  %v385_v14 = vld [vmem:[#allocation9 + $0x70] sm:$0xff] (%p365_p6) }
  0xa0   : > { %399 = vst [vmem:[#allocation2 + $0x60] sm:$0xff] (%p365_p6), %v383_v12  ;;  %400 = vst [vmem:[#allocation2 + $0x68] sm:$0xff] (%p365_p6), %v384_v13  ;;  %v386_v15 = vld [vmem:[#allocation9 + $0x78] sm:$0xff] (%p365_p6) }
  0xa1   : > { %401 = vst [vmem:[#allocation2 + $0x70] sm:$0xff] %v385_v14  ;;  %402 = vst [vmem:[#allocation2 + $0x78] sm:$0xff] %v386_v15 }
  0xa2 PF: > { %v2120_v16 = vld [vmem:[#allocation2] sm:$0xff]  ;;  %v2122_v17 = vld [vmem:[#allocation2 + $0x8] sm:$0xff]  ;;  %v1608_v39 = vld [vmem:[%s2101_s13 + $0x10] sm:$0xff]   ;;  %s676_s21 = sld [smem:[#allocation5 + %s1832_s18]]  ;;  %p935_p13 = scmp.eq.s32.totalorder %s1832_s18, 1 }
  0xa3   : > { %v2124_v18 = vld [vmem:[#allocation2 + $0x10] sm:$0xff]  ;;  %v472_v19 = vpack.c.bf16 %v2122_v17, %v2120_v16  ;;  %v2128_v20 = vld [vmem:[#allocation2 + $0x18] sm:$0xff]  ;;  %v1598_v27 = vld [vmem:[#allocation6] sm:$0xff]   ;;  %vm1852_vm0 = vmmov (%p935_p13), 0   ;;  %s2286_s12 = sld [smem:[#allocation21_spill]] (%p935_p13) }
  0xa4   : > { %v473_v21 = vpack.c.bf16 %v2128_v20, %v2124_v18  ;;  %v2132_v22 = vld [vmem:[#allocation2 + $0x20] sm:$0xff]  ;;  %v2134_v23 = vld [vmem:[#allocation2 + $0x28] sm:$0xff]  ;;  %1370 = vmatprep.mubr.bf16.mxu0 %v1598_v27  ;;  %v1609_v43 = vld [vmem:[%s2101_s13 + $0x18] sm:$0xff]  }
  0xa5   : > { %1354 = vmatprep.subr.bf16.mxu0 %v472_v19  ;;  %v2136_v24 = vld [vmem:[#allocation2 + $0x30] sm:$0xff]  ;;  %v474_v25 = vpack.c.bf16 %v2134_v23, %v2132_v22  ;;  %v2140_v26 = vld [vmem:[#allocation2 + $0x38] sm:$0xff]  ;;  %v1606_v34 = vld [vmem:[%s2101_s13] sm:$0xff]  }
  0xa6   : > { %1355 = vmatpush3.bf16.msra.mxu0 %v472_v19  ;;  %v475_v28 = vpack.c.bf16 %v2140_v26, %v2136_v24  ;;  %v2144_v29 = vld [vmem:[#allocation2 + $0x40] sm:$0xff]  ;;  %v2146_v30 = vld [vmem:[#allocation2 + $0x48] sm:$0xff]  ;;  %1386 = vmatprep.subr.bf16.mxu1 %v1606_v34  ;;  %v1600_v48 = vld [vmem:[#allocation6 + $0x10] sm:$0xff]  }
  0xa7   : > { %1356 = vmatprep.subr.bf16.mxu0 %v473_v21  ;;  %v2148_v31 = vld [vmem:[#allocation2 + $0x50] sm:$0xff]  ;;  %v476_v32 = vpack.c.bf16 %v2146_v30, %v2144_v29  ;;  %v2152_v33 = vld [vmem:[#allocation2 + $0x58] sm:$0xff]  ;;  %v1607_v35 = vld [vmem:[%s2101_s13 + $0x8] sm:$0xff]   ;;  %1387 = vmatpush3.bf16.msra.mxu1 %v1606_v34 }
  0xa8   : > { %v2156_v36 = vld [vmem:[#allocation2 + $0x60] sm:$0xff]  ;;  %v477_v37 = vpack.c.bf16 %v2152_v33, %v2148_v31  ;;  %v2160_v38 = vld [vmem:[#allocation2 + $0x68] sm:$0xff]  ;;  %1388 = vmatprep.subr.bf16.mxu1 %v1607_v35  ;;  %v2165_v41 = vld [vmem:[#allocation2 + $0x70] sm:$0xff]  ;;  %s677_s8 = sadd.f32 1.0, %s676_s21 }
  0xa9   : > { %v478_v40 = vpack.c.bf16 %v2160_v38, %v2156_v36  ;;  %v2167_v42 = vld [vmem:[#allocation2 + $0x78] sm:$0xff]  ;;  %v1610_v45 = vld [vmem:[%s2101_s13 + $0x20] sm:$0xff]   ;;  %v1611_v46 = vld [vmem:[%s2101_s13 + $0x28] sm:$0xff]  }
  0xaa   : > { %1357 = vmatpush3.bf16.msra.mxu0 %v473_v21  ;;  %v479_v44 = vpack.c.bf16 %v2167_v42, %v2165_v41  ;;  %v1599_v47 = vld [vmem:[#allocation6 + $0x8] sm:$0xff]   ;;  %v1601_v49 = vld [vmem:[#allocation6 + $0x18] sm:$0xff]   ;;  %v1602_v50 = vld [vmem:[#allocation6 + $0x20] sm:$0xff]   ;;  %v678_v56 = vstv %s677_s8 }
  0xab   : > { %1358 = vmatprep.subr.bf16.mxu0 %v474_v25  ;;  %1389 = vmatpush3.bf16.msra.mxu1 %v1607_v35  ;;  %v1603_v51 = vld [vmem:[#allocation6 + $0x28] sm:$0xff]   ;;  %v1604_v52 = vld [vmem:[#allocation6 + $0x30] sm:$0xff]   ;;  %v1605_v53 = vld [vmem:[#allocation6 + $0x38] sm:$0xff]   ;;  %v681_v57 = vmul.f32 %v678_v56, %v2124_v18  ;;  %v682_v58 = vmul.f32 %v678_v56, %v2128_v20  ;;  %v679_v60 = vmul.f32 %v678_v56, %v2120_v16 }
  0xac   : > { %1390 = vmatprep.subr.bf16.mxu1 %v1608_v39  ;;  %v1612_v54 = vld [vmem:[%s2101_s13 + $0x30] sm:$0xff]   ;;  %v1613_v55 = vld [vmem:[%s2101_s13 + $0x38] sm:$0xff]   ;;  %v680_v61 = vmul.f32 %v678_v56, %v2122_v17  ;;  %v685_v7 = vmul.f32 %v678_v56, %v2136_v24  ;;  %v686_v8 = vmul.f32 %v678_v56, %v2140_v26  ;;  %v683_v10 = vmul.f32 %v678_v56, %v2132_v22 }
  0xad   : > { %v684_v11 = vmul.f32 %v678_v56, %v2134_v23  ;;  %v689_v21 = vmul.f32 %v678_v56, %v2148_v31  ;;  %v690_v24 = vmul.f32 %v678_v56, %v2152_v33  ;;  %v687_v22 = vmul.f32 %v678_v56, %v2144_v29 }
  0xae   : > { %1359 = vmatpush3.bf16.msra.mxu0 %v474_v25  ;;  %v688_v23 = vmul.f32 %v678_v56, %v2146_v30  ;;  %v693_v31 = vmul.f32 %v678_v56, %v2165_v41  ;;  %v694_v33 = vmul.f32 %v678_v56, %v2167_v42  ;;  %v691_v29 = vmul.f32 %v678_v56, %v2156_v36  ;;  %v1270_v36 = vld [vmem:[%s363_s7] ss:$0 sm:$0xff] }
  0xaf   : > { %1360 = vmatprep.subr.bf16.mxu0 %v475_v28  ;;  %1391 = vmatpush3.bf16.msra.mxu1 %v1608_v39  ;;  %v692_v30 = vmul.f32 %v678_v56, %v2160_v38 }
  0xb0   : > { %1392 = vmatprep.subr.bf16.mxu1 %v1609_v43 }
  0xb2   : > { %1361 = vmatpush3.bf16.msra.mxu0 %v475_v28 }
  0xb3   : > { %1362 = vmatprep.subr.bf16.mxu0 %v476_v32  ;;  %1393 = vmatpush3.bf16.msra.mxu1 %v1609_v43 }
  0xb4   : > { %1394 = vmatprep.subr.bf16.mxu1 %v1610_v45 }
  0xb6   : > { %1363 = vmatpush3.bf16.msra.mxu0 %v476_v32 }
  0xb7   : > { %1364 = vmatprep.subr.bf16.mxu0 %v477_v37  ;;  %1395 = vmatpush3.bf16.msra.mxu1 %v1610_v45 }
  0xb8   : > { %1396 = vmatprep.subr.bf16.mxu1 %v1611_v46 }
  0xba   : > { %1365 = vmatpush3.bf16.msra.mxu0 %v477_v37 }
  0xbb   : > { %1366 = vmatprep.subr.bf16.mxu0 %v478_v40  ;;  %1397 = vmatpush3.bf16.msra.mxu1 %v1611_v46 }
  0xbc   : > { %1398 = vmatprep.subr.bf16.mxu1 %v1612_v54 }
  0xbe   : > { %1367 = vmatpush3.bf16.msra.mxu0 %v478_v40 }
  0xbf   : > { %1368 = vmatprep.subr.bf16.mxu0 %v479_v44  ;;  %1399 = vmatpush3.bf16.msra.mxu1 %v1612_v54 }
  0xc0   : > { %1400 = vmatprep.subr.bf16.mxu1 %v1613_v55 }
  0xc2   : > { %1369 = vmatpush3.bf16.msra.mxu0 %v479_v44 }
  0xc3   : > { %1401 = vmatpush3.bf16.msra.mxu1 %v1613_v55 }
  0xc5   : > { %1371 = vmatmul.mubr.bf16.vlgmr.msra.gmra.mrb[0].mxu0 %v1599_v47 }
  0xc6   : > { %1374 = vmatprep.mubr.bf16.mxu0 %v1600_v48 }
  0xcd   : > { %1375 = vmatmul.mubr.bf16.gmra.mrb[4].mxu0 %v1601_v49 }
  0xce   : > { %1378 = vmatprep.mubr.bf16.mxu0 %v1602_v50 }
  0xd5   : > { %1379 = vmatmul.mubr.bf16.gmra.mrb[8].mxu0 %v1603_v51 }
  0xd6   : > { %1382 = vmatprep.mubr.bf16.mxu0 %v1604_v52 }
  0xdd   : > { %1383 = vmatmul.mubr.bf16.gmra.mrb[12].mxu0 %v1605_v53 }
 0x198   : > { %v1372_v59 = vpop.f32.mrb[0].mxu0 }
 0x199   : > { %v562_v62 = vpop.f32.mrb[1].mxu0  ;;  %v713_v0 = vadd.f32 %v1372_v59, %v681_v57 }
 0x19a   : > { %v1373_v63 = vpop.f32.mrb[2].mxu0  ;;  %v711_v3 = vadd.f32 %v679_v60, %v562_v62 }
 0x19b   : > { %v714_v1 = vadd.f32 %v1373_v63, %v682_v58  ;;  %v565_v2 = vpop.f32.mrb[3].mxu0 }
 0x19c   : > { %v712_v4 = vadd.f32 %v680_v61, %v565_v2 }
 0x19d   : > { %v728_v5 = vpack.c.bf16 %v714_v1, %v713_v0 }
 0x19e   : > { %v727_v6 = vpack.c.bf16 %v712_v4, %v711_v3 }
 0x1a0   : > { %v1376_v9 = vpop.f32.mrb[4].mxu0  ;;  %1402 = vmatprep.mubr.bf16.mxu1 %v727_v6 }
 0x1a1   : > { %v578_v12 = vpop.f32.mrb[5].mxu0  ;;  %1403 = vmatmul.mubr.bf16.vlgmr.msra.gmra.mrb[0].mxu1 %v728_v5  ;;  %v717_v14 = vadd.f32 %v1376_v9, %v685_v7 }
 0x1a2   : > { %v1377_v13 = vpop.f32.mrb[6].mxu0  ;;  %v715_v17 = vadd.f32 %v683_v10, %v578_v12 }
 0x1a3   : > { %v718_v15 = vadd.f32 %v1377_v13, %v686_v8  ;;  %v581_v16 = vpop.f32.mrb[7].mxu0 }
 0x1a4   : > { %v716_v18 = vadd.f32 %v684_v11, %v581_v16 }
 0x1a5   : > { %v730_v19 = vpack.c.bf16 %v718_v15, %v717_v14 }
 0x1a6   : > { %v729_v20 = vpack.c.bf16 %v716_v18, %v715_v17 }
 0x1a8   : > { %v1380_v25 = vpop.f32.mrb[8].mxu0  ;;  %1406 = vmatprep.mubr.bf16.mxu1 %v729_v20 }
 0x1a9   : > { %v594_v26 = vpop.f32.mrb[9].mxu0  ;;  %1407 = vmatmul.mubr.bf16.gmra.mrb[4].mxu1 %v730_v19  ;;  %v721_v28 = vadd.f32 %v1380_v25, %v689_v21 }
 0x1aa   : > { %v1381_v27 = vpop.f32.mrb[10].mxu0  ;;  %v719_v35 = vadd.f32 %v687_v22, %v594_v26 }
 0x1ab   : > { %v722_v32 = vadd.f32 %v1381_v27, %v690_v24  ;;  %v597_v34 = vpop.f32.mrb[11].mxu0 }
 0x1ac   : > { %v720_v37 = vadd.f32 %v688_v23, %v597_v34 }
 0x1ad   : > { %v732_v39 = vpack.c.bf16 %v722_v32, %v721_v28 }
 0x1ae   : > { %v731_v40 = vpack.c.bf16 %v720_v37, %v719_v35 }
 0x1b0   : > { %v1384_v43 = vpop.f32.mrb[12].mxu0  ;;  %1410 = vmatprep.mubr.bf16.mxu1 %v731_v40 }
 0x1b1   : > { %v610_v44 = vpop.f32.mrb[13].mxu0  ;;  %1411 = vmatmul.mubr.bf16.gmra.mrb[8].mxu1 %v732_v39  ;;  %v725_v46 = vadd.f32 %v1384_v43, %v693_v31  ;;  %v1851_v43 = vmov (%p935_p13), 0.0|0.0  }
 0x1b2   : > { %v1385_v45 = vpop.f32.mrb[14].mxu0  ;;  %v723_v49 = vadd.f32 %v691_v29, %v610_v44  ;;  %1473 = vmatprep.subr.bf16.mxu0 (%p935_p13), %v1851_v43  ;;  %v1853_v44 = vmov (%p935_p13), 0.0  }
 0x1b3   : > { %v726_v47 = vadd.f32 %v1385_v45, %v694_v33  ;;  %v613_v48 = vpop.f32.mrb[15].mxu0  ;;  %1450 = vmatprep.mubr.msk.f32.mxu0 (%p935_p13), %vm1852_vm0, %v1853_v44  ;;  %1453 = vmatprep.subr.bf16.mxu1 (%p935_p13), %v1853_v44 }
 0x1b4   : > { %v724_v50 = vadd.f32 %v692_v30, %v613_v48 }
 0x1b5   : > { %v734_v51 = vpack.c.bf16 %v726_v47, %v725_v46 }
 0x1b6   : > { %v733_v41 = vpack.c.bf16 %v724_v50, %v723_v49  ;;  %v1614_v49 = vld [vmem:[#allocation12] sm:$0xff] (%p935_p13)  }
 0x1b7   : > { %1454 = vmatpush3.bf16.msra.mxu1 (%p935_p13), %v1614_v49 }
 0x1b8   : > { %1414 = vmatprep.mubr.bf16.mxu1 %v733_v41  ;;  %v1615_v41 = vld [vmem:[#allocation12 + $0x8] sm:$0xff] (%p935_p13)   ;;  %1455 = vmatprep.subr.bf16.mxu1 (%p935_p13), %v1853_v44 }
 0x1b9   : > { %1415 = vmatmul.mubr.bf16.gmra.mrb[12].mxu1 %v734_v51 }
 0x1ba   : > { %1469 = vmatprep.mubr.msk.bf16.mxu1 (%p935_p13), %vm1852_vm0, %v1853_v44 }
 0x1bb   : > { %1456 = vmatpush3.bf16.msra.mxu1 (%p935_p13), %v1615_v41 }
 0x1bc   : > { %1457 = vmatprep.subr.bf16.mxu1 (%p935_p13), %v1853_v44 }
 0x274   : > { %v1404_v42 = vpop.f32.mrb[0].mxu1 }
 0x275   : > { %v849_v38 = vadd.f32 %v1404_v42, %v1270_v36  ;;  %v840_v52 = vpop.f32.mrb[1].mxu1 }
 0x276   : > { %v841_v53 = vadd.f32 %v1270_v36, %v840_v52  ;;  %v1405_v54 = vpop.f32.mrb[2].mxu1  ;;  %v1616_v52 = vld [vmem:[#allocation12 + $0x10] sm:$0xff] (%p935_p13)  }
 0x277   : > { %v905_v55 = vmax.f32 %v849_v38, 0.0  ;;  %v852_v56 = vadd.f32 %v1405_v54, %v1270_v36  ;;  %v843_v57 = vpop.f32.mrb[3].mxu1  ;;  %1458 = vmatpush3.bf16.msra.mxu1 (%p935_p13), %v1616_v52 }
 0x278   : > { %v903_v58 = vmax.f32 %v841_v53, 0.0  ;;  %v844_v59 = vadd.f32 %v1270_v36, %v843_v57  ;;  %1459 = vmatprep.subr.bf16.mxu1 (%p935_p13), %v1853_v44 }
 0x279   : > { %921 = vst [vmem:[#allocation2 + $0x10] sm:$0xff] %v905_v55  ;;  %v906_v60 = vmax.f32 %v852_v56, 0.0  ;;  %v1617_v56 = vld [vmem:[#allocation12 + $0x18] sm:$0xff] (%p935_p13)  }
 0x27a   : > { %919 = vst [vmem:[#allocation2] sm:$0xff] %v903_v58  ;;  %v904_v61 = vmax.f32 %v844_v59, 0.0 }
 0x27b   : > { %922 = vst [vmem:[#allocation2 + $0x18] sm:$0xff] %v906_v60  ;;  %1460 = vmatpush3.bf16.msra.mxu1 (%p935_p13), %v1617_v56  ;;  %v1618_v60 = vld [vmem:[#allocation12 + $0x20] sm:$0xff] (%p935_p13)  }
 0x27c   : > { %920 = vst [vmem:[#allocation2 + $0x8] sm:$0xff] %v904_v61  ;;  %v1408_v62 = vpop.f32.mrb[4].mxu1  ;;  %1461 = vmatprep.subr.bf16.mxu1 (%p935_p13), %v1853_v44 }
 0x27d   : > { %v865_v63 = vadd.f32 %v1408_v62, %v1270_v36  ;;  %v856_v0 = vpop.f32.mrb[5].mxu1 }
 0x27e   : > { %v857_v1 = vadd.f32 %v1270_v36, %v856_v0  ;;  %v1409_v2 = vpop.f32.mrb[6].mxu1  ;;  %v1619_v0 = vld [vmem:[#allocation12 + $0x28] sm:$0xff] (%p935_p13)  }
 0x27f   : > { %v909_v3 = vmax.f32 %v865_v63, 0.0  ;;  %v868_v4 = vadd.f32 %v1409_v2, %v1270_v36  ;;  %v859_v5 = vpop.f32.mrb[7].mxu1  ;;  %1462 = vmatpush3.bf16.msra.mxu1 (%p935_p13), %v1618_v60  ;;  %v1620_v2 = vld [vmem:[#allocation12 + $0x30] sm:$0xff] (%p935_p13)  }
 0x280   : > { %v907_v6 = vmax.f32 %v857_v1, 0.0  ;;  %v860_v7 = vadd.f32 %v1270_v36, %v859_v5  ;;  %v942_v33 = vld [vmem:[#allocation2 + $0x10] sm:$0xff] (%p935_p13)  ;;  %1463 = vmatprep.subr.bf16.mxu1 (%p935_p13), %v1853_v44 }
 0x281   : > { %925 = vst [vmem:[#allocation2 + $0x30] sm:$0xff] %v909_v3  ;;  %v910_v8 = vmax.f32 %v868_v4, 0.0  ;;  %v940_v40 = vld [vmem:[#allocation2] sm:$0xff] (%p935_p13)  ;;  %v956_v3 = vld [vmem:[%s2253_s5] sm:$0xff] (%p935_p13)  ;;  %v1621_v4 = vld [vmem:[#allocation12 + $0x38] sm:$0xff] (%p935_p13)  }
 0x282   : > { %923 = vst [vmem:[#allocation2 + $0x20] sm:$0xff] %v907_v6  ;;  %v908_v9 = vmax.f32 %v860_v7, 0.0  ;;  %v943_v30 = vld [vmem:[#allocation2 + $0x18] sm:$0xff] (%p935_p13) }
 0x283   : > { %926 = vst [vmem:[#allocation2 + $0x38] sm:$0xff] %v910_v8  ;;  %v941_v31 = vld [vmem:[#allocation2 + $0x8] sm:$0xff] (%p935_p13)  ;;  %v1477_v45 = vpack.c.bf16 (%p935_p13), %v943_v30, %v942_v33  ;;  %1464 = vmatpush3.bf16.msra.mxu1 (%p935_p13), %v1619_v0  ;;  %v1280_v8 = vld [vmem:[%s2286_s12] ss:$0 sm:$0xff] (%p935_p13) }
 0x284   : > { %924 = vst [vmem:[#allocation2 + $0x28] sm:$0xff] %v908_v9  ;;  %v1412_v10 = vpop.f32.mrb[8].mxu1  ;;  %v1474_v29 = vpack.c.bf16 (%p935_p13), %v941_v31, %v940_v40  ;;  %1465 = vmatprep.subr.bf16.mxu1 (%p935_p13), %v1853_v44 }
 0x285   : > { %v881_v11 = vadd.f32 %v1412_v10, %v1270_v36  ;;  %v872_v12 = vpop.f32.mrb[9].mxu1 }
 0x286   : > { %v873_v13 = vadd.f32 %v1270_v36, %v872_v12  ;;  %v1413_v14 = vpop.f32.mrb[10].mxu1  ;;  %1475 = vmatpush3.bf16.msra.mxu0 (%p935_p13), %v1474_v29 }
 0x287   : > { %v913_v15 = vmax.f32 %v881_v11, 0.0  ;;  %v884_v16 = vadd.f32 %v1413_v14, %v1270_v36  ;;  %v875_v17 = vpop.f32.mrb[11].mxu1  ;;  %1476 = vmatprep.subr.bf16.mxu0 (%p935_p13), %v1851_v43  ;;  %1466 = vmatpush3.bf16.msra.mxu1 (%p935_p13), %v1620_v2 }
 0x288   : > { %v911_v18 = vmax.f32 %v873_v13, 0.0  ;;  %v876_v19 = vadd.f32 %v1270_v36, %v875_v17  ;;  %v946_v48 = vld [vmem:[#allocation2 + $0x30] sm:$0xff] (%p935_p13)  ;;  %1467 = vmatprep.subr.bf16.mxu1 (%p935_p13), %v1853_v44 }
 0x289   : > { %929 = vst [vmem:[#allocation2 + $0x50] sm:$0xff] %v913_v15  ;;  %v914_v20 = vmax.f32 %v884_v16, 0.0  ;;  %v944_v46 = vld [vmem:[#allocation2 + $0x20] sm:$0xff] (%p935_p13) }
 0x28a   : > { %927 = vst [vmem:[#allocation2 + $0x40] sm:$0xff] %v911_v18  ;;  %v912_v21 = vmax.f32 %v876_v19, 0.0  ;;  %1478 = vmatpush3.bf16.msra.mxu0 (%p935_p13), %v1477_v45  ;;  %v947_v51 = vld [vmem:[#allocation2 + $0x38] sm:$0xff] (%p935_p13) }
 0x28b   : > { %930 = vst [vmem:[#allocation2 + $0x58] sm:$0xff] %v914_v20  ;;  %v945_v47 = vld [vmem:[#allocation2 + $0x28] sm:$0xff] (%p935_p13)  ;;  %1479 = vmatprep.subr.bf16.mxu0 (%p935_p13), %v1851_v43  ;;  %v1483_v42 = vpack.c.bf16 (%p935_p13), %v947_v51, %v946_v48  ;;  %1468 = vmatpush3.bf16.msra.mxu1 (%p935_p13), %v1621_v4 }
 0x28c   : > { %928 = vst [vmem:[#allocation2 + $0x48] sm:$0xff] %v912_v21  ;;  %v1416_v24 = vpop.f32.mrb[12].mxu1  ;;  %v1480_v50 = vpack.c.bf16 (%p935_p13), %v945_v47, %v944_v46 }
 0x28d   : > { %v897_v25 = vadd.f32 %v1416_v24, %v1270_v36  ;;  %v888_v22 = vpop.f32.mrb[13].mxu1 }
 0x28e   : > { %v889_v23 = vadd.f32 %v1270_v36, %v888_v22  ;;  %v1417_v26 = vpop.f32.mrb[14].mxu1  ;;  %939 = sbr.rel (!%p935_p13) target bundleno = 1106 (0x452), region = 80  ;;  %1481 = vmatpush3.bf16.msra.mxu0 (%p935_p13), %v1480_v50 }
 0x28f   : > { %v917_v27 = vmax.f32 %v897_v25, 0.0  ;;  %v900_v28 = vadd.f32 %v1417_v26, %v1270_v36  ;;  %v891_v32 = vpop.f32.mrb[15].mxu1  ;;  %1482 = vmatprep.subr.bf16.mxu0 (%p935_p13), %v1851_v43 }
 0x290   : > { %v915_v34 = vmax.f32 %v889_v23, 0.0  ;;  %v892_v35 = vadd.f32 %v1270_v36, %v891_v32  ;;  %v950_v54 = vld [vmem:[#allocation2 + $0x50] sm:$0xff] (%p935_p13) }
 0x291   : > { %933 = vst [vmem:[#allocation2 + $0x70] sm:$0xff] %v917_v27  ;;  %v918_v37 = vmax.f32 %v900_v28, 0.0  ;;  %v948_v36 = vld [vmem:[#allocation2 + $0x40] sm:$0xff] (%p935_p13) }
 0x292   : > { %931 = vst [vmem:[#allocation2 + $0x60] sm:$0xff] %v915_v34  ;;  %v916_v39 = vmax.f32 %v892_v35, 0.0  ;;  %1484 = vmatpush3.bf16.msra.mxu0 (%p935_p13), %v1483_v42  ;;  %v951_v55 = vld [vmem:[#allocation2 + $0x58] sm:$0xff] (%p935_p13) }
 0x293   : > { %934 = vst [vmem:[#allocation2 + $0x78] sm:$0xff] %v918_v37  ;;  %v949_v38 = vld [vmem:[#allocation2 + $0x48] sm:$0xff] (%p935_p13)  ;;  %1485 = vmatprep.subr.bf16.mxu0 (%p935_p13), %v1851_v43  ;;  %v1489_v57 = vpack.c.bf16 (%p935_p13), %v951_v55, %v950_v54 }
 0x294   : > { %932 = vst [vmem:[#allocation2 + $0x68] sm:$0xff] %v916_v39  ;;  %v1486_v53 = vpack.c.bf16 (%p935_p13), %v949_v38, %v948_v36 }
 0x296   : > { %1487 = vmatpush3.bf16.msra.mxu0 %v1486_v53 }
 0x297   : > { %1488 = vmatprep.subr.bf16.mxu0 %v1851_v43 }
 0x298   : > { %v954_v62 = vld [vmem:[#allocation2 + $0x70] sm:$0xff] }
 0x299   : > { %v952_v58 = vld [vmem:[#allocation2 + $0x60] sm:$0xff] }
 0x29a   : > { %1490 = vmatpush3.bf16.msra.mxu0 %v1489_v57  ;;  %v955_v63 = vld [vmem:[#allocation2 + $0x78] sm:$0xff] }
 0x29b   : > { %v953_v59 = vld [vmem:[#allocation2 + $0x68] sm:$0xff]  ;;  %1491 = vmatprep.subr.bf16.mxu0 %v1851_v43  ;;  %v1495_v1 = vpack.c.bf16 %v955_v63, %v954_v62 }
 0x29c   : > { %v1492_v61 = vpack.c.bf16 %v953_v59, %v952_v58 }
 0x29e   : > { %1493 = vmatpush3.bf16.msra.mxu0 %v1492_v61 }
 0x29f   : > { %1494 = vmatprep.subr.bf16.mxu0 %v1851_v43 }
 0x2a2   : > { %1496 = vmatpush3.bf16.msra.mxu0 %v1495_v1 }
 0x2a5   : > { %1451 = vmatmul.mubr.f32.vlgmr.msra.gmra.mrb[0].mxu0 %v956_v3 }
 0x378   : > { %v1023_v5 = vpop.f32.mrb[0].mxu0 }
 0x379   : > { %v1027_v6 = vpack.c.bf16 %v1023_v5, %v1023_v5  ;;  %v1452_v7 = vpop.f32.mrb[1].mxu0 }
 0x37b   : > { %1470 = vmatmul.mubr.bf16.vlgmr.msra.gmra.mrb[0].mxu1 %v1027_v6 }
 0x44e   : > { %v1133_v9 = vpop.f32.mrb[0].mxu1 }
 0x44f   : > { %v1134_v10 = vadd.f32 %v1280_v8, %v1133_v9  ;;  %v1471_v11 = vpop.f32.mrb[1].mxu1 }
 0x450   : > { %v1136_v12 = vpop.f32.mrb[2].mxu1 }
 0x451   : > { %1139 = vst [vmem:[#allocation13] sm:$0xff] %v1134_v10  ;;  %v1472_v13 = vpop.f32.mrb[3].mxu1 }
 0x452 PF: > { %p1536_p1 = scmp.eq.s32.totalorder %s1941_s0, 1  ;;  %s1854_s30 = smov [#allocation13]  }
 0x453   : > { %s1147_s26 = sshll.u32 %s1854_s30, 4  ;;  %s1148_s26 = int_to_ptr.vmem [resolvable:$true] %s1147_s26 }
 0x454   : > { %s1746_s14 = scalar_lea.vmem %s1148_s26, 128  ;;  %p1753_p2 = scmp.lt.s32.totalorder %s1148_s26, %s1148_s26 }
 0x455   : > { %p1747_p4 = scmp.ne.s32.totalorder %s1148_s26, %s1746_s14  ;;  %p1754_p7 = scmp.lt.s32.totalorder %s1746_s14, %s1746_s14 }
 0x457   : > { %p1748_p5 = pnand %p1747_p4, %p1536_p1  ;;  %p1755_p8 = por %p1754_p7, %p1753_p2 }
 0x459   : > { %p1749_p11 = pneg %p1748_p5 }
 0x45b   : > { %p1756_p9 = pnand %p1755_p8, %p1749_p11 }
 0x45d   : > { %1759 = shalt.err (!%p1756_p9)
}
 0x45e   : > { %s2287_s13 = sld [smem:[#allocation22_spill]] }
 0x464   : > { %s1760_s24 = scalar_lea.hbm %s2287_s13, 128 }
 0x465   : > { %p1761_p10 = scmp.ne.s32.totalorder %s2287_s13, %s1760_s24  ;;  %p1766_p3 = scmp.lt.u32.totalorder %s1760_s24, %s2287_s13 }
 0x467   : > { %p1762_p12 = pnand %p1761_p10, %p1536_p1 }
 0x469   : > { %p1763_p0 = pneg %p1762_p12 }
 0x46b   : > { %p1768_p6 = pnand %p1766_p3, %p1763_p0 }
 0x46d   : > { %1771 = shalt.err (!%p1768_p6)
}
 0x46e   : > { %1512 = dma.vmem_to_hbm [thread:$0]  (%p1536_p1), %s1148_s26, 128, %s2287_s13, [#allocation8]  }
 0x46f   : > { %1815 = dma.done.wait (%p1536_p1), [#allocation8], 128  }
 0x470   : > { %1817 = vsyncadd (%p1536_p1), [#allocation8], 4294967168 }
 0x471 PF: > { %s25_s20 = sadd.s32 1, %s1840_s20   ;;  %s2288_s15 = smov %s1824_s16 }
 0x472   : > { %p22_p13 = scmp.ge.s32.totalorder %s25_s20, 4   ;;  %s2289_s16 = smov %s1828_s17 }
 0x473   : > { %s2290_s17 = smov %s2054_s29  ;;  %s2291_s18 = smov %s1836_s19 }
 0x474   : > { %s2292_s19 = smov %s2294_s9  ;;  %24 = sbr.rel (!%p22_p13) target bundleno = 18 (0x12), region = 117 }
 0x47b   :  { %1160 = vsyncpa [#allocation7], 1 }
 0x47c   :  { %1162 = vsyncpa [#allocation7 + $0x1], 1 }
 0x47d   :  { %1163 = vsyncpa [#allocation10], 1 }
 0x47e   :  { %1164 = vsyncpa [#allocation8], 1 }
 0x47f   :  { %1166 = vsyncpa [#allocation8 + $0x1], 1 }

</bundles_post_ra>
